<compile_context>
chip_gen: v6e
topology: v6e:2x2x1
jax: 0.10.0
libtpu: 0.0.40
codegen_flags: <defaults>
</compile_context>

<pallas_src>
import jax
import jax.numpy as jnp
import numpy as np
from jax.experimental import pallas as pl
from jax.experimental.pallas import tpu as pltpu

IN_DIM = 36
HID_DIM = 12
OUT_DIM = 5


def mlp_kernel(x_ref, w1_ref, b1_ref, w2_ref, b2_ref, o_ref):
    # x_ref: (TBp, P*36) tile of (packed) batch rows; parameters are fully resident
    # (constant index maps), so they are DMA'd once and reused across all grid steps.
    x = x_ref[...]
    h = jnp.dot(x, w1_ref[...], preferred_element_type=jnp.float32) + b1_ref[...]
    h = jnp.maximum(h, 0.0)                                   # ReLU, f32 on the VPU
    # h stays f32 for the second matmul (W2/b2 are tiny and kept f32) -> no compounded
    # rounding from downcasting the layer-1 accumulator.
    o = jnp.dot(h, w2_ref[...], preferred_element_type=jnp.float32) + b2_ref[...]
    o_ref[...] = o.astype(o_ref.dtype)


def _round_up(n, m):
    return ((n + m - 1) // m) * m


def _pick_packing(batch):
    # Largest P with batch % P == 0 and at least 8 packed rows.
    # P=32 makes the x read fully lane-dense (32*36 = 1152 = 9*128 lanes).
    for p in (32, 16, 8, 4, 2):
        if batch % p == 0 and batch // p >= 8:
            return p
    return 1


def mlp_forward(x, w1, b1, w2, b2, *, block_rows=8192, min_tiles=2,
                compute_dtype=jnp.bfloat16):
    """x: (B, 36); w1: (36, 12); b1: (12,); w2: (12, 5); b2: (5,)  ->  (B, 5) float32.

    block_rows:    target batch rows per tile (balanced across tiles).
    min_tiles:     minimum number of grid steps (>=2 lets v7x megacore shard the batch axis).
    compute_dtype: dtype for x / W1 (dominant HBM read). None keeps f32. Accumulation,
                   h, W2, biases and the output are always f32.
    """
    B = x.shape[0]
    assert x.shape[1] == IN_DIM

    # ---- row packing for a lane-dense x read (pure metadata reshape, no HBM pass) ----
    P = _pick_packing(B)
    Bp = B // P
    in_w, hid_w, out_w = P * IN_DIM, P * HID_DIM, P * OUT_DIM

    if P > 1:
        eye = jnp.eye(P, dtype=jnp.float32)
        w1p = jnp.kron(eye, w1.astype(jnp.float32))    # (P*36, P*12) block-diagonal
        w2p = jnp.kron(eye, w2.astype(jnp.float32))    # (P*12, P*5)  block-diagonal
        b1p = jnp.tile(b1, P)
        b2p = jnp.tile(b2, P)
    else:
        w1p, w2p, b1p, b2p = w1, w2, b1, b2

    xp = x.reshape(Bp, in_w)
    if compute_dtype is not None:
        xp = xp.astype(compute_dtype)
        w1p = w1p.astype(compute_dtype)
    w2p = w2p.astype(jnp.float32)
    b1p = b1p.reshape(1, hid_w).astype(jnp.float32)
    b2p = b2p.reshape(1, out_w).astype(jnp.float32)

    # ---- balanced batch tiling over packed rows (no jnp.pad; ragged last block is fine) ----
    max_rows_p = max(1, block_rows // P)
    n_tiles = max(min_tiles, pl.cdiv(Bp, max_rows_p))
    TBp = _round_up(pl.cdiv(Bp, n_tiles), 8)
    if TBp >= Bp:
        TBp = Bp                                        # single full-extent block
    grid = (pl.cdiv(Bp, TBp),)

    out = pl.pallas_call(
        mlp_kernel,
        out_shape=jax.ShapeDtypeStruct((Bp, out_w), jnp.float32),
        grid=grid,
        in_specs=[
            # Batch-tiled input: new block each grid step (double-buffered DMA).
            pl.BlockSpec((TBp, in_w), lambda i: (i, 0)),
            # Parameters: constant index maps -> fetched once, stay resident in VMEM.
            pl.BlockSpec((in_w, hid_w), lambda i: (0, 0)),
            pl.BlockSpec((1, hid_w), lambda i: (0, 0)),
            pl.BlockSpec((hid_w, out_w), lambda i: (0, 0)),
            pl.BlockSpec((1, out_w), lambda i: (0, 0)),
        ],
        out_specs=pl.BlockSpec((TBp, out_w), lambda i: (i, 0)),
        compiler_params=pltpu.CompilerParams(
            dimension_semantics=("parallel",),           # megacore sharding on v7x
            vmem_limit_bytes=32 * 1024 * 1024,
        ),
    )(xp, w1p, b1p, w2p, b2p)

    return out.reshape(B, OUT_DIM)


def init_params(key):
    """Deterministic init mimicking PyTorch nn.Linear default (U[-1/sqrt(fan_in), +])."""
    k1, k2, k3, k4 = jax.random.split(key, 4)
    bound1 = 1.0 / jnp.sqrt(IN_DIM)
    bound2 = 1.0 / jnp.sqrt(HID_DIM)
    # Stored as (in, out) so the kernel computes x @ W (+ b) directly.
    w1 = jax.random.uniform(k1, (IN_DIM, HID_DIM), jnp.float32, -bound1, bound1)
    b1 = jax.random.uniform(k2, (HID_DIM,), jnp.float32, -bound1, bound1)
    w2 = jax.random.uniform(k3, (HID_DIM, OUT_DIM), jnp.float32, -bound2, bound2)
    b2 = jax.random.uniform(k4, (OUT_DIM,), jnp.float32, -bound2, bound2)
    return w1, b1, w2, b2


if __name__ == "__main__":
    key = jax.random.PRNGKey(0)
    k_par, k1, k2, k3 = jax.random.split(key, 4)
    w1, b1, w2, b2 = init_params(k_par)

    w1n, b1n = np.asarray(w1, np.float64), np.asarray(b1, np.float64)
    w2n, b2n = np.asarray(w2, np.float64), np.asarray(b2, np.float64)

    def ref_fwd(xa):
        xn = np.asarray(xa, np.float64)
        return np.maximum(xn @ w1n + b1n, 0.0) @ w2n + b2n

    # Small shape consistent with the module: batch=8, features=36 (P=1, single tile).
    x = jax.random.normal(k1, (8, IN_DIM), jnp.float32)
    out = jax.block_until_ready(mlp_forward(x, w1, b1, w2, b2))
    assert out.shape == (8, OUT_DIM)
    assert np.allclose(np.asarray(out), ref_fwd(x), atol=5e-2, rtol=5e-2)

    # Ragged batch: P=4 packing, 2 grid steps, masked boundary block (no jnp.pad).
    x2 = jax.random.normal(k2, (300, IN_DIM), jnp.float32)
    out2 = jax.block_until_ready(mlp_forward(x2, w1, b1, w2, b2))
    assert out2.shape == (300, OUT_DIM)
    assert np.allclose(np.asarray(out2), ref_fwd(x2), atol=5e-2, rtol=5e-2)

    # Fully lane-dense P=32 path, multi-step pipeline: f32 path (tighter check) + bf16 default.
    x3 = jax.random.normal(k3, (1280, IN_DIM), jnp.float32)
    out3_f32 = jax.block_until_ready(
        mlp_forward(x3, w1, b1, w2, b2, block_rows=256, compute_dtype=None))
    assert out3_f32.shape == (1280, OUT_DIM)
    assert np.allclose(np.asarray(out3_f32), ref_fwd(x3), atol=2e-2, rtol=2e-2)
    out3_bf16 = jax.block_until_ready(
        mlp_forward(x3, w1, b1, w2, b2, block_rows=256))
    assert np.allclose(np.asarray(out3_bf16), ref_fwd(x3), atol=5e-2, rtol=5e-2)

    # Odd batch -> P=1 fallback with a ragged last tile.
    x4 = jax.random.normal(k1, (37, IN_DIM), jnp.float32)
    out4 = jax.block_until_ready(mlp_forward(x4, w1, b1, w2, b2))
    assert out4.shape == (37, OUT_DIM)
    assert np.allclose(np.asarray(out4), ref_fwd(x4), atol=5e-2, rtol=5e-2)

    print("KERNEL_OK")
</pallas_src>

<mosaic_0001>
module attributes {stable_mosaic.version = 11 : i64} {
  func.func @mlp_kernel(%arg0: i32, %arg1: memref<8x36xbf16, #tpu.memory_space<vmem>>, %arg2: memref<36x12xbf16, #tpu.memory_space<vmem>>, %arg3: memref<1x12xf32, #tpu.memory_space<vmem>>, %arg4: memref<12x5xf32, #tpu.memory_space<vmem>>, %arg5: memref<1x5xf32, #tpu.memory_space<vmem>>, %arg6: memref<8x5xf32, #tpu.memory_space<vmem>>) attributes {dimension_semantics = [#tpu.dimension_semantics<parallel>], iteration_bounds = array<i64: 1>, scalar_prefetch = 0 : i64, scratch_operands = 0 : i64, tpu.core_type = #tpu.core_type<tc>, window_params = [{transform_indices = @transform_0, window_bounds = array<i64: 8, 36>}, {pipeline_mode = #tpu.pipeline_mode<synchronous>, transform_indices = @transform_1, window_bounds = array<i64: 36, 12>}, {pipeline_mode = #tpu.pipeline_mode<synchronous>, transform_indices = @transform_2, window_bounds = array<i64: 1, 12>}, {pipeline_mode = #tpu.pipeline_mode<synchronous>, transform_indices = @transform_3, window_bounds = array<i64: 12, 5>}, {pipeline_mode = #tpu.pipeline_mode<synchronous>, transform_indices = @transform_4, window_bounds = array<i64: 1, 5>}, {transform_indices = @transform_5, window_bounds = array<i64: 8, 5>}]} {
    %c0 = arith.constant 0 : index
    %c0_0 = arith.constant 0 : index
    %0 = vector.load %arg1[%c0, %c0_0] : memref<8x36xbf16, #tpu.memory_space<vmem>>, vector<8x36xbf16>
    %c0_1 = arith.constant 0 : index
    %c0_2 = arith.constant 0 : index
    %1 = vector.load %arg2[%c0_1, %c0_2] : memref<36x12xbf16, #tpu.memory_space<vmem>>, vector<36x12xbf16>
    %cst = arith.constant dense<0.000000e+00> : vector<8x12xf32>
    %2 = tpu.matmul %0, %1, %cst {dimension_numbers = #tpu.dot_dimension_numbers<[1], [0], [0], [1], [0, 0, 1, 1], [], []>} : vector<8x36xbf16>, vector<36x12xbf16>, vector<8x12xf32> -> vector<8x12xf32>
    %c0_3 = arith.constant 0 : index
    %c0_4 = arith.constant 0 : index
    %3 = vector.load %arg3[%c0_3, %c0_4] : memref<1x12xf32, #tpu.memory_space<vmem>>, vector<1x12xf32>
    %4 = vector.broadcast %3 : vector<1x12xf32> to vector<8x12xf32>
    %5 = arith.addf %2, %4 : vector<8x12xf32>
    %cst_5 = arith.constant 0.000000e+00 : f32
    %6 = vector.broadcast %cst_5 : f32 to vector<8x12xf32>
    %7 = arith.maximumf %5, %6 : vector<8x12xf32>
    %c0_6 = arith.constant 0 : index
    %c0_7 = arith.constant 0 : index
    %8 = vector.load %arg4[%c0_6, %c0_7] : memref<12x5xf32, #tpu.memory_space<vmem>>, vector<12x5xf32>
    %cst_8 = arith.constant dense<0.000000e+00> : vector<8x5xf32>
    %9 = tpu.matmul %7, %8, %cst_8 {dimension_numbers = #tpu.dot_dimension_numbers<[1], [0], [0], [1], [0, 0, 1, 1], [], []>} : vector<8x12xf32>, vector<12x5xf32>, vector<8x5xf32> -> vector<8x5xf32>
    %c0_9 = arith.constant 0 : index
    %c0_10 = arith.constant 0 : index
    %10 = vector.load %arg5[%c0_9, %c0_10] : memref<1x5xf32, #tpu.memory_space<vmem>>, vector<1x5xf32>
    %11 = vector.broadcast %10 : vector<1x5xf32> to vector<8x5xf32>
    %12 = arith.addf %9, %11 : vector<8x5xf32>
    %c0_11 = arith.constant 0 : index
    %c0_12 = arith.constant 0 : index
    %13 = vector.load %arg6[%c0_11, %c0_12] : memref<8x5xf32, #tpu.memory_space<vmem>>, vector<8x5xf32>
    tpu.vector_store %arg6[%c0_11, %c0_12], %12 {strides = array<i32>} : memref<8x5xf32, #tpu.memory_space<vmem>>, vector<8x5xf32>,
    return
  }
  func.func @transform_0(%arg0: i32) -> (i32, i32) {
    %c0_i32 = arith.constant 0 : i32
    %c0_i32_0 = arith.constant 0 : i32
    return %arg0, %c0_i32 : i32, i32
  }
  func.func @transform_1(%arg0: i32) -> (i32, i32) {
    %c0_i32 = arith.constant 0 : i32
    %c0_i32_0 = arith.constant 0 : i32
    %c0_i32_1 = arith.constant 0 : i32
    return %c0_i32, %c0_i32_0 : i32, i32
  }
  func.func @transform_2(%arg0: i32) -> (i32, i32) {
    %c0_i32 = arith.constant 0 : i32
    %c0_i32_0 = arith.constant 0 : i32
    %c0_i32_1 = arith.constant 0 : i32
    return %c0_i32, %c0_i32_0 : i32, i32
  }
  func.func @transform_3(%arg0: i32) -> (i32, i32) {
    %c0_i32 = arith.constant 0 : i32
    %c0_i32_0 = arith.constant 0 : i32
    %c0_i32_1 = arith.constant 0 : i32
    return %c0_i32, %c0_i32_0 : i32, i32
  }
  func.func @transform_4(%arg0: i32) -> (i32, i32) {
    %c0_i32 = arith.constant 0 : i32
    %c0_i32_0 = arith.constant 0 : i32
    %c0_i32_1 = arith.constant 0 : i32
    return %c0_i32, %c0_i32_0 : i32, i32
  }
  func.func @transform_5(%arg0: i32) -> (i32, i32) {
    %c0_i32 = arith.constant 0 : i32
    %c0_i32_0 = arith.constant 0 : i32
    return %arg0, %c0_i32 : i32, i32
  }
}

</mosaic_0001>

<bundles_post_ra>
// kernel: tpu_custom_call.1
= control target key start
LH: loop header
LB: loop body
LE: loop exit
PB: predicated region body
PF: predicated region fallthrough
CT: control target
= control target key end

     0   :  { %v262_v1 = vmov 0.0   ;;  %vm54_vm0 = vcmask 1041408   ;;  %vm263_vm1 = vmmov 0   ;;  %s322_s0 = inlined_call_operand.vmem [shape: bf16[8,36], index: 0, kind: input, shape index: {}]   ;;  %s323_s1 = inlined_call_operand.vmem [shape: bf16[36,12], index: 1, kind: input, shape index: {}]   ;;  %s324_s2 = inlined_call_operand.vmem [shape: f32[1,12], index: 2, kind: input, shape index: {}]   ;;  %s325_s3 = inlined_call_operand.vmem [shape: f32[12,5], index: 3, kind: input, shape index: {}]   ;;  %s326_s4 = inlined_call_operand.vmem [shape: f32[1,5], index: 4, kind: input, shape index: {}]   ;;  %s327_s5 = inlined_call_operand.hbm [shape: f32[8,5], index: 5, kind: output, shape index: {}]  }
   0x1   :  { %v237_v0 = vld [vmem:[%s323_s1 + $0x10] ss:$0 sps:$4 sm:$0x33]   ;;  %217 = vmatprep.subr.bf16.mxu0 %v262_v1  ;;  %227 = vmatprep.subr.mxu1 %v262_v1  ;;  %v238_v3 = vld [vmem:[%s323_s1 + $0x8] sm:$0xff]  }
   0x2   :  { %v56_v2 = vsel %vm54_vm0, %v237_v0, 0  ;;  %223 = vmatprep.mubr.msk.bf16.mxu0 %vm263_vm1, %v262_v1 }
   0x3   :  { %218 = vmatpush3.bf16.msra.mxu0 %v56_v2 }
   0x4   :  { %219 = vmatprep.subr.bf16.mxu0 %v262_v1 }
   0x5   :  { %10 = vsyncpa [#allocation3], 0  ;;  %231 = vmatprep.mubr.msk.f32.mxu1 %vm263_vm1, %v262_v1  ;;  %v239_v4 = vld [vmem:[%s323_s1] sm:$0xff]   ;;  %vm50_vm2 = vcmask 293888   ;;  %v100_v6 = vld [vmem:[%s325_s3 + $0x8] sm:$0xf] }
   0x6   :  { %v22_v5 = vld [vmem:[%s322_s0] sm:$0xf]  ;;  %vm112_vm3 = vcmask 1043456   ;;  %vm108_vm4 = vcmask 97280   ;;  %s264_s7 = smov [#allocation2]   ;;  %vm186_vm5 = vcmask 39936  }
   0x7   :  { %220 = vmatpush3.bf16.msra.mxu0 %v238_v3  ;;  %228 = vmatpush3.msk.msra.mxu1 %vm112_vm3, %v100_v6  ;;  %v99_v7 = vld [vmem:[%s325_s3] sm:$0xff]  ;;  %s194_s8 = sshll.u32 %s264_s7, 4  ;;  %s195_s8 = int_to_ptr.vmem [resolvable:$true] %s194_s8 }
   0x8   :  { %221 = vmatprep.subr.bf16.mxu0 %v262_v1  ;;  %229 = vmatprep.subr.mxu1 %v262_v1  ;;  %v202_v8 = vld [vmem:[%s324_s2] ss:$0 sm:$0xff]  ;;  %s240_s2 = scalar_lea.vmem %s195_s8, 128  ;;  %p245_p1 = scmp.lt.s32.totalorder %s195_s8, %s195_s8 }
   0x9   :  { %230 = vmatpush3.msra.mxu1 %v99_v7  ;;  %v207_v15 = vld [vmem:[%s326_s4] ss:$0 sm:$0xff]  ;;  %p241_p0 = scmp.ne.s32.totalorder %s195_s8, %s240_s2  ;;  %p246_p2 = scmp.lt.s32.totalorder %s240_s2, %s240_s2 }
   0xb   :  { %222 = vmatpush3.bf16.msra.mxu0 %v239_v4  ;;  %p247_p3 = por %p246_p2, %p245_p1 }
   0xd   :  { %p248_p4 = pnand %p247_p3, %p241_p0 }
   0xe   :  { %224 = vmatmul.mubr.msk.bf16.vlgmr.msra.gmra.mxu0 %vm50_vm2, %v22_v5 }
  0xce   :  { %v92_v9 = vpop.f32.mrf.mxu0 }
  0xcf   :  { %v93_v10 = vadd.f32 %v202_v8, %v92_v9 }
  0xd0   :  { %v225_v11 = vpop.f32.mrf.mxu0 }
  0xd1   :  { %v98_v12 = vmax.f32 %v93_v10, 0.0 }
  0xd2   :  { %v95_v13 = vpop.f32.mrf.mxu0 }
  0xd3   :  { %232 = vmatmul.mubr.msk.f32.vlgmr.msra.gmra.mxu1 %vm108_vm4, %v98_v12 }
  0xd4   :  { %v226_v14 = vpop.f32.mrf.mxu0 }
 0x193   :  { %v182_v16 = vpop.f32.mrf.mxu1 }
 0x194   :  { %v183_v17 = vadd.f32 %v207_v15, %v182_v16 }
 0x195   :  { %v233_v18 = vpop.f32.mrf.mxu1 }
 0x196   :  { %187 = vst.msk [vmem:[#allocation2] sm:$0xff] %vm186_vm5, %v183_v17 }
 0x197   :  { %251 = shalt.err (!%p248_p4)
}
 0x198   :  { %197 = dma.vmem_to_hbm [thread:$0]  %s195_s8, 128, %s327_s5, [#allocation3]  }
 0x199   :  { %260 = dma.done.wait [#allocation3], 128  }
 0x19a   :  { %261 = vsyncadd [#allocation3], 4294967168 }
 0x19b   :  { %201 = vsyncpa [#allocation3], 1 }

</bundles_post_ra>
